<compile_context>
chip_gen: v6e
topology: v6e:2x2x1
jax: 0.10.0
libtpu: 0.0.40
codegen_flags: <defaults>
</compile_context>

<pallas_src>
import jax
import jax.numpy as jnp
from jax.experimental import pallas as pl
from jax.experimental.pallas import tpu as pltpu

_OUT_PAD = 128  # lane-dense output width (true out_features is 16)


def _overarch_kernel(dense_ref, sparse_ref, wd_ref, ws_ref, b_ref, out_ref):
    # [tb, 8] @ [8, 128]  +  [tb, Fs] @ [Fs, 128]  +  [1, 128]
    acc = jnp.dot(dense_ref[...], wd_ref[...], preferred_element_type=jnp.float32)
    acc = acc + jnp.dot(sparse_ref[...], ws_ref[...],
                        preferred_element_type=jnp.float32)
    out_ref[...] = (acc + b_ref[...]).astype(out_ref.dtype)


def prepare_params(weight, bias, d_dense, compute_dtype=jnp.bfloat16):
    """One-time (hoist out of the step loop) weight prep.

    weight: [16, 8 + Fs] torch nn.Linear layout, bias: [16].
    Returns lane-padded, pre-transposed [K, 128] weight halves and [1, 128] bias.
    """
    out_features, in_features = weight.shape
    pad = _OUT_PAD - out_features
    w_t = jnp.pad(weight.T, ((0, 0), (0, pad)))                 # [K, 128]
    w_dense = w_t[:d_dense].astype(compute_dtype)               # [8, 128]
    w_sparse = w_t[d_dense:].astype(compute_dtype)              # [Fs, 128]
    bias_p = jnp.pad(bias, (0, pad)).reshape(1, _OUT_PAD).astype(jnp.float32)
    return w_dense, w_sparse, bias_p, out_features


def _choose_tile_b(batch):
    # Full batch if small (block == full dim is exempt from the (8,128) rule);
    # otherwise a fixed 1024-row tile (multiple of 8/16, ~0.5 MiB f32 output
    # per buffer) that fits comfortably inside v7x's 32 MiB scoped VMEM.
    return batch if batch <= 1024 else 1024


def sequence_over_arch(dense, sparse, w_dense, w_sparse, bias_p, out_features,
                       tile_b=None):
    """dense: [B, 8], sparse: [B, Fs]; w_dense/w_sparse/bias_p from prepare_params."""
    B, d_dense = dense.shape
    _, d_sparse = sparse.shape
    assert w_dense.shape == (d_dense, _OUT_PAD)
    assert w_sparse.shape == (d_sparse, _OUT_PAD)

    compute_dtype = w_dense.dtype
    dense_c = dense.astype(compute_dtype)
    sparse_c = sparse.astype(compute_dtype)

    if tile_b is None:
        tile_b = _choose_tile_b(B)
    grid = (pl.cdiv(B, tile_b),)

    item = jnp.dtype(compute_dtype).itemsize
    cost = pl.CostEstimate(
        flops=2 * B * (d_dense + d_sparse) * _OUT_PAD,
        transcendentals=0,
        bytes_accessed=(B * (d_dense + d_sparse) * item
                        + (d_dense + d_sparse) * _OUT_PAD * item
                        + B * _OUT_PAD * 4),
    )

    out_padded = pl.pallas_call(
        _overarch_kernel,
        out_shape=jax.ShapeDtypeStruct((B, _OUT_PAD), jnp.float32),
        grid=grid,
        in_specs=[
            pl.BlockSpec((tile_b, d_dense), lambda i: (i, 0)),      # dense rows
            pl.BlockSpec((tile_b, d_sparse), lambda i: (i, 0)),     # sparse rows
            pl.BlockSpec((d_dense, _OUT_PAD), lambda i: (0, 0)),    # resident
            pl.BlockSpec((d_sparse, _OUT_PAD), lambda i: (0, 0)),   # resident
            pl.BlockSpec((1, _OUT_PAD), lambda i: (0, 0)),          # resident
        ],
        out_specs=pl.BlockSpec((tile_b, _OUT_PAD), lambda i: (i, 0)),
        compiler_params=pltpu.CompilerParams(
            dimension_semantics=("parallel",),       # megacore split on v7x
            vmem_limit_bytes=32 * 1024 * 1024,       # safe on v5e/v6e/v7x
        ),
        cost_estimate=cost,
    )(dense_c, sparse_c, w_dense, w_sparse, bias_p)

    return out_padded[:, :out_features]


def reference(dense, sparse, weight, bias):
    x = jnp.concatenate([dense, sparse], axis=1)
    return x @ weight.T + bias


if __name__ == "__main__":
    # Synthetic table config: 2 tables, embedding_dim=4, 1 feature name each.
    # in_features = 8 + sum(4 * 1 * 20) over 2 tables = 8 + 160 = 168.
    batch = 8
    dense_dim = 8
    sparse_dim = 2 * (4 * 1 * 20)          # 160
    in_features = dense_dim + sparse_dim   # 168
    out_features = 16

    key = jax.random.PRNGKey(0)
    k_d, k_s, k_w, k_b = jax.random.split(key, 4)

    dense = jax.random.normal(k_d, (batch, dense_dim), dtype=jnp.float32)
    sparse = jax.random.normal(k_s, (batch, sparse_dim), dtype=jnp.float32)

    # Deterministic nn.Linear-style init (uniform in +/- 1/sqrt(in_features)).
    bound = 1.0 / (in_features ** 0.5)
    weight = jax.random.uniform(k_w, (out_features, in_features),
                                minval=-bound, maxval=bound, dtype=jnp.float32)
    bias = jax.random.uniform(k_b, (out_features,),
                              minval=-bound, maxval=bound, dtype=jnp.float32)

    ref = reference(dense, sparse, weight, bias)

    # Exactness check with f32 compute path.
    wd32, ws32, bp32, of = prepare_params(weight, bias, dense_dim,
                                          compute_dtype=jnp.float32)
    out_f32 = jax.block_until_ready(
        sequence_over_arch(dense, sparse, wd32, ws32, bp32, of))
    assert out_f32.shape == (batch, out_features)
    assert jnp.allclose(out_f32, ref, atol=1e-5, rtol=1e-5)

    # Fast bf16 path (halves HBM traffic; f32 MXU accumulation).
    wdbf, wsbf, bpbf, of = prepare_params(weight, bias, dense_dim,
                                          compute_dtype=jnp.bfloat16)
    out_bf16 = jax.block_until_ready(
        sequence_over_arch(dense, sparse, wdbf, wsbf, bpbf, of))
    assert out_bf16.shape == (batch, out_features)
    assert jnp.allclose(out_bf16, ref, atol=5e-2, rtol=5e-2)

    print("KERNEL_OK")
</pallas_src>

<mosaic_0001>
module attributes {stable_mosaic.version = 11 : i64} {
  func.func @_overarch_kernel(%arg0: i32, %arg1: memref<8x8xf32, #tpu.memory_space<vmem>>, %arg2: memref<8x160xf32, #tpu.memory_space<vmem>>, %arg3: memref<8x128xf32, #tpu.memory_space<vmem>>, %arg4: memref<160x128xf32, #tpu.memory_space<vmem>>, %arg5: memref<1x128xf32, #tpu.memory_space<vmem>>, %arg6: memref<8x128xf32, #tpu.memory_space<vmem>>) attributes {dimension_semantics = [#tpu.dimension_semantics<parallel>], iteration_bounds = array<i64: 1>, scalar_prefetch = 0 : i64, scratch_operands = 0 : i64, tpu.core_type = #tpu.core_type<tc>, window_params = [{transform_indices = @transform_0, window_bounds = array<i64: 8, 8>}, {transform_indices = @transform_1, window_bounds = array<i64: 8, 160>}, {pipeline_mode = #tpu.pipeline_mode<synchronous>, transform_indices = @transform_2, window_bounds = array<i64: 8, 128>}, {pipeline_mode = #tpu.pipeline_mode<synchronous>, transform_indices = @transform_3, window_bounds = array<i64: 160, 128>}, {pipeline_mode = #tpu.pipeline_mode<synchronous>, transform_indices = @transform_4, window_bounds = array<i64: 1, 128>}, {transform_indices = @transform_5, window_bounds = array<i64: 8, 128>}]} {
    %c0 = arith.constant 0 : index
    %c0_0 = arith.constant 0 : index
    %0 = vector.load %arg1[%c0, %c0_0] : memref<8x8xf32, #tpu.memory_space<vmem>>, vector<8x8xf32>
    %c0_1 = arith.constant 0 : index
    %c0_2 = arith.constant 0 : index
    %1 = vector.load %arg3[%c0_1, %c0_2] : memref<8x128xf32, #tpu.memory_space<vmem>>, vector<8x128xf32>
    %cst = arith.constant dense<0.000000e+00> : vector<8x128xf32>
    %2 = tpu.matmul %0, %1, %cst {dimension_numbers = #tpu.dot_dimension_numbers<[1], [0], [0], [1], [0, 0, 1, 1], [], []>} : vector<8x8xf32>, vector<8x128xf32>, vector<8x128xf32> -> vector<8x128xf32>
    %c0_3 = arith.constant 0 : index
    %c0_4 = arith.constant 0 : index
    %3 = vector.load %arg2[%c0_3, %c0_4] : memref<8x160xf32, #tpu.memory_space<vmem>>, vector<8x160xf32>
    %c0_5 = arith.constant 0 : index
    %c0_6 = arith.constant 0 : index
    %4 = vector.load %arg4[%c0_5, %c0_6] : memref<160x128xf32, #tpu.memory_space<vmem>>, vector<160x128xf32>
    %cst_7 = arith.constant dense<0.000000e+00> : vector<8x128xf32>
    %5 = tpu.matmul %3, %4, %cst_7 {dimension_numbers = #tpu.dot_dimension_numbers<[1], [0], [0], [1], [0, 0, 1, 1], [], []>} : vector<8x160xf32>, vector<160x128xf32>, vector<8x128xf32> -> vector<8x128xf32>
    %6 = arith.addf %2, %5 : vector<8x128xf32>
    %c0_8 = arith.constant 0 : index
    %c0_9 = arith.constant 0 : index
    %7 = vector.load %arg5[%c0_8, %c0_9] : memref<1x128xf32, #tpu.memory_space<vmem>>, vector<1x128xf32>
    %8 = vector.broadcast %7 : vector<1x128xf32> to vector<8x128xf32>
    %9 = arith.addf %6, %8 : vector<8x128xf32>
    %c0_10 = arith.constant 0 : index
    %c0_11 = arith.constant 0 : index
    %10 = vector.load %arg6[%c0_10, %c0_11] : memref<8x128xf32, #tpu.memory_space<vmem>>, vector<8x128xf32>
    tpu.vector_store %arg6[%c0_10, %c0_11], %9 {strides = array<i32>} : memref<8x128xf32, #tpu.memory_space<vmem>>, vector<8x128xf32>,
    return
  }
  func.func @transform_0(%arg0: i32) -> (i32, i32) {
    %c0_i32 = arith.constant 0 : i32
    %c0_i32_0 = arith.constant 0 : i32
    return %arg0, %c0_i32 : i32, i32
  }
  func.func @transform_1(%arg0: i32) -> (i32, i32) {
    %c0_i32 = arith.constant 0 : i32
    %c0_i32_0 = arith.constant 0 : i32
    return %arg0, %c0_i32 : i32, i32
  }
  func.func @transform_2(%arg0: i32) -> (i32, i32) {
    %c0_i32 = arith.constant 0 : i32
    %c0_i32_0 = arith.constant 0 : i32
    %c0_i32_1 = arith.constant 0 : i32
    return %c0_i32, %c0_i32_0 : i32, i32
  }
  func.func @transform_3(%arg0: i32) -> (i32, i32) {
    %c0_i32 = arith.constant 0 : i32
    %c0_i32_0 = arith.constant 0 : i32
    %c0_i32_1 = arith.constant 0 : i32
    return %c0_i32, %c0_i32_0 : i32, i32
  }
  func.func @transform_4(%arg0: i32) -> (i32, i32) {
    %c0_i32 = arith.constant 0 : i32
    %c0_i32_0 = arith.constant 0 : i32
    %c0_i32_1 = arith.constant 0 : i32
    return %c0_i32, %c0_i32_0 : i32, i32
  }
  func.func @transform_5(%arg0: i32) -> (i32, i32) {
    %c0_i32 = arith.constant 0 : i32
    %c0_i32_0 = arith.constant 0 : i32
    return %arg0, %c0_i32 : i32, i32
  }
}

</mosaic_0001>

<bundles_post_ra>
// kernel: tpu_custom_call.1
= control target key start
LH: loop header
LB: loop body
LE: loop exit
PB: predicated region body
PF: predicated region fallthrough
CT: control target
= control target key end

     0   :  { %10 = vsyncpa [#allocation3], 0  ;;  %s474_s0 = inlined_call_operand.hbm [shape: f32[8,8], index: 0, kind: input, shape index: {}]   ;;  %s475_s1 = inlined_call_operand.hbm [shape: f32[8,160], index: 1, kind: input, shape index: {}]   ;;  %s476_s2 = inlined_call_operand.hbm [shape: f32[8,128], index: 2, kind: input, shape index: {}]   ;;  %s477_s3 = inlined_call_operand.hbm [shape: f32[160,128], index: 3, kind: input, shape index: {}]   ;;  %s478_s4 = inlined_call_operand.vmem [shape: f32[1,128], index: 4, kind: input, shape index: {}]   ;;  %s479_s5 = inlined_call_operand.hbm [shape: f32[8,128], index: 5, kind: output, shape index: {}]  }
   0x1   :  { %11 = vsyncpa [#allocation6], 0 }
   0x2   :  { %12 = vsyncpa [#allocation9], 0 }
   0x3   :  { %13 = vsyncpa [#allocation4], 0  ;;  %s395_s18 = smov [#allocation5]   ;;  %s396_s20 = smov [#allocation2]  }
   0x4   :  { %s30_s19 = sshll.u32 %s395_s18, 4  ;;  %s20_s21 = sshll.u32 %s396_s20, 4  ;;  %s31_s19 = int_to_ptr.vmem [resolvable:$true] %s30_s19  ;;  %s21_s21 = int_to_ptr.vmem [resolvable:$true] %s20_s21 }
   0x5   :  { %s295_s22 = scalar_lea.vmem %s31_s19, 256  ;;  %p300_p1 = scmp.lt.s32.totalorder %s31_s19, %s31_s19 }
   0x6   :  { %p296_p0 = scmp.ne.s32.totalorder %s31_s19, %s295_s22  ;;  %p301_p2 = scmp.lt.s32.totalorder %s295_s22, %s295_s22 }
   0x8   :  { %p302_p3 = por %p301_p2, %p300_p1 }
   0xa   :  { %p303_p4 = pnand %p302_p3, %p296_p0 }
   0xc   :  { %306 = shalt.err (!%p303_p4)
}
   0xd   :  { %33 = dma.hbm_to_vmem [thread:$0]  %s475_s1, 256, %s31_s19, [#allocation6]  }
   0xe   :  { %s315_s25 = scalar_lea.vmem %s21_s21, 128  ;;  %p320_p6 = scmp.lt.s32.totalorder %s21_s21, %s21_s21 }
   0xf   :  { %p316_p5 = scmp.ne.s32.totalorder %s21_s21, %s315_s25  ;;  %p321_p7 = scmp.lt.s32.totalorder %s315_s25, %s315_s25 }
  0x11   :  { %p322_p8 = por %p321_p7, %p320_p6 }
  0x13   :  { %p323_p9 = pnand %p322_p8, %p316_p5 }
  0x15   :  { %326 = shalt.err (!%p323_p9)
}
  0x16   :  { %23 = dma.hbm_to_vmem [thread:$0]  %s474_s0, 128, %s21_s21, [#allocation3]  }
  0x17   :  { %s397_s28 = smov [#allocation7]   ;;  %s398_s30 = smov [#allocation8]  }
  0x18   :  { %s40_s29 = sshll.u32 %s397_s28, 4  ;;  %s49_s6 = sshll.u32 %s398_s30, 4  ;;  %s41_s29 = int_to_ptr.vmem [resolvable:$true] %s40_s29  ;;  %s50_s6 = int_to_ptr.vmem [resolvable:$true] %s49_s6 }
  0x19   :  { %s335_s7 = scalar_lea.vmem %s41_s29, 128  ;;  %p340_p11 = scmp.lt.s32.totalorder %s41_s29, %s41_s29 }
  0x1a   :  { %p336_p10 = scmp.ne.s32.totalorder %s41_s29, %s335_s7  ;;  %p341_p12 = scmp.lt.s32.totalorder %s335_s7, %s335_s7 }
  0x1c   :  { %p342_p13 = por %p341_p12, %p340_p11 }
  0x1e   :  { %p343_p0 = pnand %p342_p13, %p336_p10 }
  0x20   :  { %346 = shalt.err (!%p343_p0)
}
  0x21   :  { %43 = dma.hbm_to_vmem [thread:$0]  %s476_s2, 128, %s41_s29, [#allocation6]  }
  0x22   :  { %s355_s9 = scalar_lea.vmem %s50_s6, 2560  ;;  %p360_p2 = scmp.lt.s32.totalorder %s50_s6, %s50_s6 }
  0x23   :  { %p356_p1 = scmp.ne.s32.totalorder %s50_s6, %s355_s9  ;;  %p361_p3 = scmp.lt.s32.totalorder %s355_s9, %s355_s9 }
  0x25   :  { %p362_p4 = por %p361_p3, %p360_p2 }
  0x27   :  { %p363_p5 = pnand %p362_p4, %p356_p1 }
  0x29   :  { %366 = shalt.err (!%p363_p5)
}
  0x2a   :  { %s399_s0 = smov 128   ;;  %s400_s10 = smov 8  }
  0x2b   :  { %55 = dma.hbm_to_vmem [thread:$0]  %s477_s3, 2560, %s50_s6, [#allocation9], %s399_s0, %s399_s0, %s400_s10  }
  0x2c   :  { %387 = dma.done.wait [#allocation3], 128  }
  0x2d   :  { %388 = vsyncadd [#allocation3], 4294967168 }
  0x2e   :  { %389 = dma.done.wait [#allocation6], 384  }
  0x2f   :  { %390 = vsyncadd [#allocation6], 4294966912 }
  0x30   :  { %391 = dma.done.wait [#allocation9], 2560  }
  0x31   :  { %392 = vsyncadd [#allocation9], 4294964736  ;;  %v401_v0 = vmov 0.0   ;;  %vm402_vm0 = vmmov 0   ;;  %v89_v1 = vld [vmem:[#allocation8 + $0x78] sm:$0xff]  ;;  %v88_v2 = vld [vmem:[#allocation8 + $0x70] sm:$0xff] }
  0x32   :  { %98 = vmatprep.subr.mxu0 %v401_v0  ;;  %273 = vmatprep.subr.mxu1 %v401_v0  ;;  %v87_v3 = vld [vmem:[#allocation8 + $0x68] sm:$0xff]  ;;  %v86_v4 = vld [vmem:[#allocation8 + $0x60] sm:$0xff]  ;;  %vm168_vm1 = vcmask 64512   ;;  %v85_v5 = vld [vmem:[#allocation8 + $0x58] sm:$0xff]  ;;  %vm94_vm2 = vcmask 261120   ;;  %s403_s13 = smov [#allocation10]  }
  0x33   :  { %275 = vmatprep.mubr.msk.f32.mxu1 %vm402_vm0, %v401_v0  ;;  %99 = vmatpush1.msra.mxu0 %v89_v1  ;;  %v71_v6 = vld [vmem:[#allocation7] sm:$0xff]  ;;  %v70_v7 = vld [vmem:[#allocation2] sm:$0xff]  ;;  %v73_v8 = vld [vmem:[#allocation5 + $0x8] sm:$0xff]  ;;  %s257_s14 = sshll.u32 %s403_s13, 4  ;;  %s258_s14 = int_to_ptr.vmem [resolvable:$true] %s257_s14 }
  0x34   :  { %100 = vmatprep.subr.mxu0 %v401_v0  ;;  %274 = vmatpush3.msra.mxu1 %v71_v6  ;;  %v84_v9 = vld [vmem:[#allocation8 + $0x50] sm:$0xff]  ;;  %v83_v10 = vld [vmem:[#allocation8 + $0x48] sm:$0xff]  ;;  %v82_v11 = vld [vmem:[#allocation8 + $0x40] sm:$0xff]  ;;  %s367_s15 = scalar_lea.vmem %s258_s14, 128  ;;  %p372_p7 = scmp.lt.s32.totalorder %s258_s14, %s258_s14 }
  0x35   :  { %101 = vmatpush1.msra.mxu0 %v88_v2  ;;  %276 = vmatmul.mubr.msk.f32.vlgmr.msra.gmra.mxu1 %vm168_vm1, %v70_v7  ;;  %v81_v12 = vld [vmem:[#allocation8 + $0x38] sm:$0xff]  ;;  %v80_v13 = vld [vmem:[#allocation8 + $0x30] sm:$0xff]  ;;  %v79_v14 = vld [vmem:[#allocation8 + $0x28] sm:$0xff]  ;;  %p368_p6 = scmp.ne.s32.totalorder %s258_s14, %s367_s15  ;;  %p373_p8 = scmp.lt.s32.totalorder %s367_s15, %s367_s15 }
  0x36   :  { %102 = vmatprep.subr.mxu0 %v401_v0  ;;  %268 = vmatprep.mubr.msk.f32.mxu0 %vm94_vm2, %v73_v8  ;;  %v78_v15 = vld [vmem:[#allocation8 + $0x20] sm:$0xff]  ;;  %v77_v16 = vld [vmem:[#allocation8 + $0x18] sm:$0xff]  ;;  %v76_v17 = vld [vmem:[#allocation8 + $0x10] sm:$0xff] }
  0x37   :  { %103 = vmatpush1.msra.mxu0 %v87_v3  ;;  %v75_v18 = vld [vmem:[#allocation8 + $0x8] sm:$0xff]  ;;  %v74_v19 = vld [vmem:[#allocation8] sm:$0xff]  ;;  %v93_v20 = vld [vmem:[#allocation8 + $0x98] sm:$0xff]  ;;  %p374_p9 = por %p373_p8, %p372_p7 }
  0x38   :  { %104 = vmatprep.subr.mxu0 %v401_v0  ;;  %v92_v21 = vld [vmem:[#allocation8 + $0x90] sm:$0xff]  ;;  %v91_v22 = vld [vmem:[#allocation8 + $0x88] sm:$0xff]  ;;  %v90_v23 = vld [vmem:[#allocation8 + $0x80] sm:$0xff] }
  0x39   :  { %105 = vmatpush1.msra.mxu0 %v86_v4  ;;  %v72_v24 = vld [vmem:[#allocation5] sm:$0xff]  ;;  %v270_v28 = vld [vmem:[%s478_s4] ss:$0 sm:$0xff]  ;;  %p375_p10 = pnand %p374_p9, %p368_p6 }
  0x3a   :  { %106 = vmatprep.subr.mxu0 %v401_v0 }
  0x3b   :  { %107 = vmatpush1.msra.mxu0 %v85_v5 }
  0x3c   :  { %108 = vmatprep.subr.mxu0 %v401_v0 }
  0x3d   :  { %109 = vmatpush1.msra.mxu0 %v84_v9 }
  0x3e   :  { %110 = vmatprep.subr.mxu0 %v401_v0 }
  0x3f   :  { %111 = vmatpush1.msra.mxu0 %v83_v10 }
  0x40   :  { %112 = vmatprep.subr.mxu0 %v401_v0 }
  0x41   :  { %113 = vmatpush1.msra.mxu0 %v82_v11 }
  0x42   :  { %114 = vmatprep.subr.mxu0 %v401_v0 }
  0x43   :  { %115 = vmatpush1.msra.mxu0 %v81_v12 }
  0x44   :  { %116 = vmatprep.subr.mxu0 %v401_v0 }
  0x45   :  { %117 = vmatpush1.msra.mxu0 %v80_v13 }
  0x46   :  { %118 = vmatprep.subr.mxu0 %v401_v0 }
  0x47   :  { %119 = vmatpush1.msra.mxu0 %v79_v14 }
  0x48   :  { %120 = vmatprep.subr.mxu0 %v401_v0 }
  0x49   :  { %121 = vmatpush1.msra.mxu0 %v78_v15 }
  0x4a   :  { %122 = vmatprep.subr.mxu0 %v401_v0 }
  0x4b   :  { %123 = vmatpush1.msra.mxu0 %v77_v16 }
  0x4c   :  { %124 = vmatprep.subr.mxu0 %v401_v0 }
  0x4d   :  { %125 = vmatpush1.msra.mxu0 %v76_v17 }
  0x4e   :  { %126 = vmatprep.subr.mxu0 %v401_v0 }
  0x4f   :  { %127 = vmatpush1.msra.mxu0 %v75_v18 }
  0x50   :  { %128 = vmatprep.subr.mxu0 %v401_v0 }
  0x51   :  { %129 = vmatpush1.msra.mxu0 %v74_v19 }
  0x52   :  { %154 = vmatprep.subr.mxu0 %v401_v0 }
  0x53   :  { %155 = vmatpush2.msra.mxu0 %v93_v20 }
  0x54   :  { %156 = vmatprep.subr.mxu0 %v401_v0 }
  0x55   :  { %157 = vmatpush2.msra.mxu0 %v92_v21 }
  0x56   :  { %158 = vmatprep.subr.mxu0 %v401_v0 }
  0x57   :  { %159 = vmatpush2.msra.mxu0 %v91_v22 }
  0x58   :  { %160 = vmatprep.subr.mxu0 %v401_v0 }
  0x59   :  { %161 = vmatpush2.msra.mxu0 %v90_v23 }
  0x5a   :  { %163 = vmatmul.mubr.f32.vlgmr.msra.gmra.mxu0 %v72_v24 }
  0xf5   :  { %v238_v25 = vpop.f32.mrf.mxu1 }
  0xf7   :  { %v277_v26 = vpop.f32.mrf.mxu1 }
 0x11a   :  { %v164_v27 = vpop.f32.mrf.mxu0 }
 0x11b   :  { %v239_v29 = vadd.f32 %v238_v25, %v164_v27 }
 0x11c   :  { %v166_v30 = vpop.f32.mrf.mxu0 }
 0x11d   :  { %v249_v31 = vadd.f32 %v270_v28, %v239_v29 }
 0x11f   :  { %250 = vst [vmem:[#allocation10] sm:$0xff] %v249_v31 }
 0x120   :  { %378 = shalt.err (!%p375_p10)
}
 0x121   :  { %260 = dma.vmem_to_hbm [thread:$0]  %s258_s14, 128, %s479_s5, [#allocation4]  }
 0x122   :  { %393 = dma.done.wait [#allocation4], 128  }
 0x123   :  { %394 = vsyncadd [#allocation4], 4294967168 }
 0x124   :  { %264 = vsyncpa [#allocation3], 1 }
 0x125   :  { %265 = vsyncpa [#allocation6], 1 }
 0x126   :  { %266 = vsyncpa [#allocation9], 1 }
 0x127   :  { %267 = vsyncpa [#allocation4], 1 }

</bundles_post_ra>
